<compile_context>
chip_gen: v7x
topology: tpu7x:2x2x1
jax: 0.10.0
libtpu: 0.0.40
codegen_flags: <defaults>
</compile_context>

<pallas_src>
import jax
import jax.numpy as jnp
from jax.experimental import pallas as pl
from jax.experimental.pallas import tpu as pltpu


def metanext_kernel(x_ref, w1t_ref, b1_ref, w2t_ref, b2_ref, o_ref):
    # x_ref/o_ref: (C, TM) f32 tile (spatial on lanes). Weights/biases resident.
    x = x_ref[...]                                   # shortcut + matmul input (f32)
    xm = x.astype(w1t_ref.dtype)                     # bf16 (or f32) MXU operand
    # fc1 (1x1 conv, BN pre-folded) + ReLU; accumulate in f32
    h = jnp.dot(w1t_ref[...], xm, preferred_element_type=jnp.float32)   # (HID, TM)
    h = jnp.maximum(h + b1_ref[...], 0.0)
    # fc2 (1x1 conv, gamma pre-folded)
    z = jnp.dot(w2t_ref[...], h.astype(w2t_ref.dtype),
                preferred_element_type=jnp.float32)                     # (C, TM)
    # bias + residual (drop_path = identity), all in f32
    o_ref[...] = z + b2_ref[...] + x


def metanext_block(x_nchw, params, *, tm=512, compute_dtype=jnp.bfloat16):
    B, C, H, W = x_nchw.shape
    HID = params["w1"].shape[1]
    HW = H * W

    # --- fold BN into fc1 and gamma into fc2 (runs once, tiny tensors) -------
    eps = 1e-5
    s = params["bn_w"] / jnp.sqrt(params["bn_var"] + eps)        # (C,)
    t = params["bn_b"] - params["bn_mean"] * s                   # (C,)
    gamma = params["gamma"]                                      # (C,)
    # stored w1:(C,HID), w2:(HID,C);  kernel wants left-multiplied transposes
    w1t = (params["w1"] * s[:, None]).T.astype(compute_dtype)    # (HID, C)
    b1f = (t @ params["w1"] + params["b1"]).reshape(HID, 1)      # (HID, 1) f32
    w2t = (params["w2"] * gamma[None, :]).T.astype(compute_dtype)  # (C, HID)
    b2f = (params["b2"] * gamma).reshape(C, 1)                   # (C, 1) f32

    # --- NCHW -> (B, C, HW): metadata-only reshape, no HBM transpose ---------
    x3 = x_nchw.reshape(B, C, HW).astype(jnp.float32)

    # spatial tile: multiple of 128 (lane-dense stores), no larger than the data
    tm = max(128, (min(tm, HW) // 128) * 128)
    HWp = pl.cdiv(HW, tm) * tm
    if HWp != HW:
        x3 = jnp.pad(x3, ((0, 0), (0, 0), (0, HWp - HW)))        # pad tail tile

    # VMEM budget: x/out tiles (f32, double-buffered) + weights + h intermediate.
    wbytes = jnp.dtype(compute_dtype).itemsize
    est = (4 * C * tm * 4                 # x + out, 2 buffers each, f32
           + 4 * C * HID * wbytes         # w1t + w2t, 2 buffers each
           + HID * tm * 4                 # (HID, TM) intermediate
           + 4 * (HID + C) * 4)           # biases
    vmem_limit = int(min(48 * 1024 * 1024, max(32 * 1024 * 1024, 2 * est)))

    const = lambda b, m: (0, 0)
    out3 = pl.pallas_call(
        metanext_kernel,
        out_shape=jax.ShapeDtypeStruct((B, C, HWp), jnp.float32),
        grid_spec=pltpu.PrefetchScalarGridSpec(
            num_scalar_prefetch=0,
            grid=(B, HWp // tm),
            in_specs=[
                pl.BlockSpec((pl.Squeezed(), C, tm), lambda b, m: (b, 0, m)),  # x tile
                pl.BlockSpec((HID, C), const),                                 # fc1 wT (BN folded)
                pl.BlockSpec((HID, 1), const),                                 # fc1 bias (folded)
                pl.BlockSpec((C, HID), const),                                 # fc2 wT (gamma folded)
                pl.BlockSpec((C, 1), const),                                   # fc2 bias (gamma folded)
            ],
            out_specs=pl.BlockSpec((pl.Squeezed(), C, tm), lambda b, m: (b, 0, m)),
        ),
        compiler_params=pltpu.CompilerParams(
            dimension_semantics=("parallel", "parallel"),
            vmem_limit_bytes=vmem_limit),
    )(x3, w1t, b1f, w2t, b2f)

    # drop the spatial padding, back to NCHW (metadata-only)
    return out3[:, :, :HW].reshape(B, C, H, W)


def make_params(key, dim, mlp_ratio=4, ls_init_value=1e-6):
    hid = int(mlp_ratio * dim)
    ks = jax.random.split(key, 6)
    return {
        # BatchNorm2d(dim): weight, bias, running stats (synthetic, deterministic)
        "bn_w": jax.random.uniform(ks[0], (dim,), jnp.float32, 0.5, 1.5),
        "bn_b": jax.random.normal(ks[1], (dim,), jnp.float32) * 0.1,
        "bn_mean": jax.random.normal(ks[2], (dim,), jnp.float32) * 0.1,
        "bn_var": jax.random.uniform(ks[3], (dim,), jnp.float32, 0.5, 1.5),
        # ConvMlp: fc1 1x1 conv (dim -> hid), fc2 1x1 conv (hid -> dim);
        # stored as (in, out) matmul matrices.
        "w1": jax.random.normal(ks[4], (dim, hid), jnp.float32) * 0.1,
        "b1": jnp.linspace(-0.1, 0.1, hid, dtype=jnp.float32),
        "w2": jax.random.normal(ks[5], (hid, dim), jnp.float32) * 0.1,
        "b2": jnp.linspace(-0.05, 0.05, dim, dtype=jnp.float32),
        # layer scale
        "gamma": jnp.full((dim,), ls_init_value, dtype=jnp.float32),
    }


def metanext_block_ref(x, p):
    """Pure-JAX reference (NCHW), mirrors the PyTorch forward in eval mode."""
    eps = 1e-5
    shortcut = x
    c = x.shape[1]
    s = p["bn_w"] / jnp.sqrt(p["bn_var"] + eps)
    scale = s.reshape(1, c, 1, 1)
    bias = (p["bn_b"] - p["bn_mean"] * s).reshape(1, c, 1, 1)
    y = x * scale + bias
    h = jnp.einsum("bchw,cd->bdhw", y, p["w1"]) + p["b1"].reshape(1, -1, 1, 1)
    h = jnp.maximum(h, 0.0)
    z = jnp.einsum("bchw,cd->bdhw", h, p["w2"]) + p["b2"].reshape(1, -1, 1, 1)
    z = z * p["gamma"].reshape(1, -1, 1, 1)
    return z + shortcut


if __name__ == "__main__":
    key = jax.random.PRNGKey(0)
    kx, kp = jax.random.split(key)

    # --- config 1: module defaults (ls_init_value=1e-6), bf16 MXU operands ---
    B, C, H, W = 2, 4, 16, 16            # dim=4, hidden=4*dim=16
    x = jax.random.normal(kx, (B, C, H, W), jnp.float32)
    params = make_params(kp, C)
    out = jax.block_until_ready(metanext_block(x, params, tm=512,
                                               compute_dtype=jnp.bfloat16))
    ref = metanext_block_ref(x, params)
    assert out.shape == x.shape
    assert jnp.allclose(out, ref, atol=1e-5, rtol=1e-5), \
        float(jnp.max(jnp.abs(out - ref)))

    # --- config 2: ragged spatial size (exercises tail padding) and gamma=1.0
    # so the MLP branch is not hidden under the 1e-6 layer scale; f32 operands.
    kx2, kp2 = jax.random.split(jax.random.PRNGKey(1))
    x2 = jax.random.normal(kx2, (2, 8, 9, 13), jnp.float32)   # H*W=117, not /128
    params2 = make_params(kp2, 8, ls_init_value=1.0)
    out2 = jax.block_until_ready(metanext_block(x2, params2, tm=512,
                                                compute_dtype=jnp.float32))
    ref2 = metanext_block_ref(x2, params2)
    assert out2.shape == x2.shape
    assert jnp.allclose(out2, ref2, atol=1e-4, rtol=1e-4), \
        float(jnp.max(jnp.abs(out2 - ref2)))

    print("KERNEL_OK")
</pallas_src>

<mosaic_0001>
module attributes {stable_mosaic.version = 11 : i64} {
  func.func @metanext_kernel(%arg0: i32, %arg1: i32, %arg2: memref<1x4x256xf32, #tpu.memory_space<vmem>>, %arg3: memref<16x4xbf16, #tpu.memory_space<vmem>>, %arg4: memref<16x1xf32, #tpu.memory_space<vmem>>, %arg5: memref<4x16xbf16, #tpu.memory_space<vmem>>, %arg6: memref<4x1xf32, #tpu.memory_space<vmem>>, %arg7: memref<1x4x256xf32, #tpu.memory_space<vmem>>) attributes {dimension_semantics = [#tpu.dimension_semantics<parallel>, #tpu.dimension_semantics<parallel>], iteration_bounds = array<i64: 2, 1>, scalar_prefetch = 0 : i64, scratch_operands = 0 : i64, tpu.core_type = #tpu.core_type<tc>, window_params = [{transform_indices = @transform_0, window_bounds = array<i64: 1, 4, 256>}, {pipeline_mode = #tpu.pipeline_mode<synchronous>, transform_indices = @transform_1, window_bounds = array<i64: 16, 4>}, {pipeline_mode = #tpu.pipeline_mode<synchronous>, transform_indices = @transform_2, window_bounds = array<i64: 16, 1>}, {pipeline_mode = #tpu.pipeline_mode<synchronous>, transform_indices = @transform_3, window_bounds = array<i64: 4, 16>}, {pipeline_mode = #tpu.pipeline_mode<synchronous>, transform_indices = @transform_4, window_bounds = array<i64: 4, 1>}, {transform_indices = @transform_5, window_bounds = array<i64: 1, 4, 256>}]} {
    %c0 = arith.constant 0 : index
    %c0_0 = arith.constant 0 : index
    %c0_1 = arith.constant 0 : index
    %0 = vector.load %arg2[%c0, %c0_0, %c0_1] : memref<1x4x256xf32, #tpu.memory_space<vmem>>, vector<1x4x256xf32>
    %1 = vector.shape_cast %0 : vector<1x4x256xf32> to vector<4x256xf32>
    %2 = arith.truncf %1 : vector<4x256xf32> to vector<4x256xbf16>
    %c0_2 = arith.constant 0 : index
    %c0_3 = arith.constant 0 : index
    %3 = vector.load %arg3[%c0_2, %c0_3] : memref<16x4xbf16, #tpu.memory_space<vmem>>, vector<16x4xbf16>
    %cst = arith.constant dense<0.000000e+00> : vector<16x256xf32>
    %4 = tpu.matmul %3, %2, %cst {dimension_numbers = #tpu.dot_dimension_numbers<[1], [0], [0], [1], [0, 0, 1, 1], [], []>} : vector<16x4xbf16>, vector<4x256xbf16>, vector<16x256xf32> -> vector<16x256xf32>
    %c0_4 = arith.constant 0 : index
    %c0_5 = arith.constant 0 : index
    %5 = vector.load %arg4[%c0_4, %c0_5] : memref<16x1xf32, #tpu.memory_space<vmem>>, vector<16x1xf32>
    %6 = vector.broadcast %5 : vector<16x1xf32> to vector<16x256xf32>
    %7 = arith.addf %4, %6 : vector<16x256xf32>
    %cst_6 = arith.constant 0.000000e+00 : f32
    %8 = vector.broadcast %cst_6 : f32 to vector<16x256xf32>
    %9 = arith.maximumf %7, %8 : vector<16x256xf32>
    %c0_7 = arith.constant 0 : index
    %c0_8 = arith.constant 0 : index
    %10 = vector.load %arg5[%c0_7, %c0_8] : memref<4x16xbf16, #tpu.memory_space<vmem>>, vector<4x16xbf16>
    %11 = arith.truncf %9 : vector<16x256xf32> to vector<16x256xbf16>
    %cst_9 = arith.constant dense<0.000000e+00> : vector<4x256xf32>
    %12 = tpu.matmul %10, %11, %cst_9 {dimension_numbers = #tpu.dot_dimension_numbers<[1], [0], [0], [1], [0, 0, 1, 1], [], []>} : vector<4x16xbf16>, vector<16x256xbf16>, vector<4x256xf32> -> vector<4x256xf32>
    %c0_10 = arith.constant 0 : index
    %c0_11 = arith.constant 0 : index
    %13 = vector.load %arg6[%c0_10, %c0_11] : memref<4x1xf32, #tpu.memory_space<vmem>>, vector<4x1xf32>
    %14 = vector.broadcast %13 : vector<4x1xf32> to vector<4x256xf32>
    %15 = arith.addf %12, %14 : vector<4x256xf32>
    %16 = arith.addf %15, %1 : vector<4x256xf32>
    %c0_12 = arith.constant 0 : index
    %c0_13 = arith.constant 0 : index
    %c0_14 = arith.constant 0 : index
    %17 = vector.load %arg7[%c0_12, %c0_13, %c0_14] : memref<1x4x256xf32, #tpu.memory_space<vmem>>, vector<1x4x256xf32>
    %18 = vector.shape_cast %17 : vector<1x4x256xf32> to vector<4x256xf32>
    %19 = vector.shape_cast %16 : vector<4x256xf32> to vector<1x4x256xf32>
    tpu.vector_store %arg7[%c0_12, %c0_13, %c0_14], %19 {strides = array<i32>} : memref<1x4x256xf32, #tpu.memory_space<vmem>>, vector<1x4x256xf32>,
    return
  }
  func.func @transform_0(%arg0: i32, %arg1: i32) -> (i32, i32, i32) {
    %c0_i32 = arith.constant 0 : i32
    %c0_i32_0 = arith.constant 0 : i32
    return %arg0, %c0_i32, %arg1 : i32, i32, i32
  }
  func.func @transform_1(%arg0: i32, %arg1: i32) -> (i32, i32) {
    %c0_i32 = arith.constant 0 : i32
    %c0_i32_0 = arith.constant 0 : i32
    %c0_i32_1 = arith.constant 0 : i32
    return %c0_i32, %c0_i32_0 : i32, i32
  }
  func.func @transform_2(%arg0: i32, %arg1: i32) -> (i32, i32) {
    %c0_i32 = arith.constant 0 : i32
    %c0_i32_0 = arith.constant 0 : i32
    %c0_i32_1 = arith.constant 0 : i32
    return %c0_i32, %c0_i32_0 : i32, i32
  }
  func.func @transform_3(%arg0: i32, %arg1: i32) -> (i32, i32) {
    %c0_i32 = arith.constant 0 : i32
    %c0_i32_0 = arith.constant 0 : i32
    %c0_i32_1 = arith.constant 0 : i32
    return %c0_i32, %c0_i32_0 : i32, i32
  }
  func.func @transform_4(%arg0: i32, %arg1: i32) -> (i32, i32) {
    %c0_i32 = arith.constant 0 : i32
    %c0_i32_0 = arith.constant 0 : i32
    %c0_i32_1 = arith.constant 0 : i32
    return %c0_i32, %c0_i32_0 : i32, i32
  }
  func.func @transform_5(%arg0: i32, %arg1: i32) -> (i32, i32, i32) {
    %c0_i32 = arith.constant 0 : i32
    %c0_i32_0 = arith.constant 0 : i32
    return %arg0, %c0_i32, %arg1 : i32, i32, i32
  }
}

</mosaic_0001>

<bundles_post_ra>
// kernel: tpu_custom_call.1
= control target key start
LH: loop header
LB: loop body
LE: loop exit
PB: predicated region body
PF: predicated region fallthrough
CT: control target
= control target key end

     0   :  { %10 = vsyncpa [#allocation3], 0  ;;  %s810_s0 = inlined_call_operand.vmem [shape: f32[2,4,256], index: 0, kind: input, shape index: {}]   ;;  %s811_s1 = inlined_call_operand.vmem [shape: bf16[16,4], index: 1, kind: input, shape index: {}]   ;;  %s812_s2 = inlined_call_operand.vmem [shape: f32[16,1], index: 2, kind: input, shape index: {}]   ;;  %s813_s3 = inlined_call_operand.vmem [shape: bf16[4,16], index: 3, kind: input, shape index: {}]   ;;  %s814_s4 = inlined_call_operand.vmem [shape: f32[4,1], index: 4, kind: input, shape index: {}]   ;;  %s815_s5 = inlined_call_operand.hbm [shape: f32[2,4,256], index: 5, kind: output, shape index: {}]  }
   0x1   :  { %12 = vsyncpa [#allocation3 + $0x1], 0  ;;  %s683_s18 = smov 0   ;;  %s685_s19 = smov 0  }
   0x2   :  { %s687_s20 = smov 0   ;;  %s689_s21 = smov 0  }
   0x3   :  { %s691_s22 = smov 0   ;;  %s693_s23 = smov 0  }
   0x4 LB: > { %s492_s24 = sadd.s32 4294967295, %s649_s23   ;;  %s493_s25 = sadd.s32 4294967294, %s649_s23   ;;  %s649_s23 = sphi %s693_s23, %s18_s23   ;;  %s645_s22 = sphi %s691_s22, %s822_s22   ;;  %s641_s21 = sphi %s689_s21, %s821_s21   ;;  %s637_s20 = sphi %s687_s20, %s820_s20   ;;  %s633_s19 = sphi %s685_s19, %s819_s19   ;;  %s629_s18 = sphi %s683_s18, %s818_s18  }
   0x5   : > { %s30_s26 = sadd.s32 1, %s645_s22  ;;  %s151_s27 = sadd.s32 1, %s637_s20 }
   0x6   : > { %p32_p0 = scmp.ge.s32.totalorder %s30_s26, 2  ;;  %p161_p1 = scmp.ne.s32.totalorder %s637_s20, %s633_s19 }
   0x7   : > { %p162_p2 = scmp.eq.s32.totalorder %s492_s24, 1  ;;  %p167_p3 = scmp.ne.s32.totalorder %s633_s19, %s629_s18 }
   0x8   : > { %s824_s26 = smov (%p32_p0, %s30_s26), 0  ;;  %p168_p5 = scmp.eq.s32.totalorder %s493_s25, 1 }
   0x9   : > { %p723_p4 = por %p162_p2, %p161_p1  ;;  %s146_s29 = ssub.s32 %s645_s22, %s824_s26 }
   0xa   : > { %p496_p6 = scmp.ge.s32.totalorder %s649_s23, 1  ;;  %p149_p7 = scmp.eq.s32.totalorder %s146_s29, 0 }
   0xb   : > { %p730_p8 = por %p168_p5, %p167_p3  ;;  %p211_p9 = scmp.lt.s32.totalorder %s649_s23, 3 }
   0xc   : > { %s736_s6 = scalar_select %p149_p7, %s637_s20, %s151_s27  }
   0xd   : > { %p212_p10 = pnand %p496_p6, %p211_p9 }
   0xe   : > { %p244_p11 = scmp.lt.s32.totalorder (!%p212_p10), %s641_s21, 1  ;;  %v651_v0 = vmov (!%p212_p10), 0   ;;  %v263_v1 = vld [vmem:[%s812_s2] sm:$0xff] (!%p212_p10)  ;;  %v264_v2 = vld [vmem:[%s812_s2 + $0x8] sm:$0xff] (!%p212_p10)  ;;  %vm284_vm0 = vcmask (!%p212_p10), 1041408   ;;  %vm280_vm1 = vcmask (!%p212_p10), 31744  }
   0xf   : > { %215 = sbr.rel (%p212_p10) target bundleno = 493 (0x1ed), region = 40  ;;  %323 = vmatprep.mubr.bf16.mxu0 (!%p212_p10), %v651_v0  ;;  %567 = vset.pattern.permute.xlu0 (!%p212_p10), %v651_v0  ;;  %v570_v8 = vld [vmem:[%s811_s1] sm:$0xff] (!%p212_p10)   ;;  %vm347_vm2 = vcmask (!%p212_p10), 130048   ;;  %s240_s7 = sand.u32 (!%p212_p10), 1, %s633_s19  }
  0x10   : > { %267 = vperm.xlu0 (!%p212_p10), %567, %v263_v1   ;;  %383 = vmatprep.mubr.bf16.mxu1 (!%p212_p10), %v651_v0  ;;  %v341_v9 = vld [vmem:[%s814_s4] sm:$0xf] (!%p212_p10)  ;;  %s497_s8 = sshll.u32 (!%p212_p10), %s240_s7, 3 }
  0x11   : > { %568 = vset.pattern.permute.xlu1 (!%p212_p10), %v651_v0  ;;  %v338_v26 = vld [vmem:[%s813_s3] sm:$0x3] (!%p212_p10)  ;;  %s242_s10 = scalar_lea.vmem (!%p212_p10), [#allocation2], %s497_s8 }
  0x12   : > { %344 = vperm.xlu1 (!%p212_p10), %568, %v341_v9   ;;  %s416_s11 = sshll.u32 (!%p212_p10), %s242_s10, 4  ;;  %s765_s11 = int_to_ptr.vmem [resolvable:$true] %s416_s11 }
  0x13   : > { %s571_s16 = scalar_lea.vmem (!%p212_p10), %s765_s11, 128 }
  0x14   : > { %272 = vperm.xlu0 (!%p212_p10), %567, %v264_v2   ;;  %p572_p12 = scmp.ne.s32.totalorder (!%p212_p10), %s765_s11, %s571_s16 }
  0x16   : > { %s245_s9 = scalar_select %p244_p11, %s641_s21, 1 }
  0x17   : > { %p573_p13 = pnand %p572_p12, %p723_p4 }
  0x18   : > { %s509_s12 = sshll.u32 %s245_s9, 3  ;;  %s510_s9 = sshll.u32 %s641_s21, 7 }
  0x19   : > { %s251_s15 = scalar_lea.vmem %s810_s0, %s509_s12  ;;  %s763_s14 = scalar_lea.hbm %s815_s5, %s510_s9 }
  0x1a   : > { %v255_v3 = vld [vmem:[%s251_s15] sm:$0xff]  ;;  %s400_s15 = scalar_lea.sflag [#allocation3], %s240_s7  ;;  %p574_p0 = pneg %p573_p13 }
  0x1b   : > { %v257_v4 = vcombine.high %v255_v3, %v255_v3  ;;  %v259_v5 = vpack.c.bf16 %v255_v3, %v255_v3  ;;  %s652_s21 = smov [#allocation2]  }
  0x1c   : > { %s575_s17 = sshll.u32 %s652_s21, 4  ;;  %s576_s17 = int_to_ptr.vmem [resolvable:$false] %s575_s17 }
  0x1d   : > { %v260_v6 = vpack.c.bf16 %v257_v4, %v257_v4  ;;  %v286_v7 = vsel %vm284_vm0, %v259_v5, 0  ;;  %s577_s24 = scalar_lea.vmem %s576_s17, 256  ;;  %p578_p1 = scmp.lt.s32.totalorder %s765_s11, %s576_s17 }
  0x1e   : > { %p579_p2 = scmp.lt.s32.totalorder %s577_s24, %s571_s16 }
  0x1f   : > { %501 = vmatprep.subr.msk.bf16.mxu0 %vm284_vm0, %v260_v6 }
  0x20   : > { %292 = vmatpush1.bf16.msra.mxu0 %v286_v7  ;;  %p580_p3 = por %p579_p2, %p578_p1 }
  0x22   : > { %p581_p5 = pnand %p580_p3, %p574_p0 }
  0x23   : > { %502 = vmatmul.mubr.msk.bf16.vlgmr.msra.gmra.mrb[0].mxu0 %vm280_vm1, %v570_v8 }
  0x8f   : > { %v268_v10 = vpop.permute.xlu0 %267 }
  0x91   : > { %v345_v27 = vpop.permute.xlu1 %344 }
  0x93   : > { %v273_v14 = vpop.permute.xlu0 %272 }
  0xf6   : > { %v325_v11 = vpop.f32.mrb[0].mxu0 }
  0xf7   : > { %v326_v12 = vadd.f32 %v325_v11, %v268_v10  ;;  %v327_v13 = vpop.f32.mrb[1].mxu0 }
  0xf8   : > { %v328_v15 = vadd.f32 %v327_v13, %v268_v10  ;;  %v329_v16 = vpop.f32.mrb[2].mxu0 }
  0xf9   : > { %v330_v17 = vadd.f32 %v329_v16, %v273_v14  ;;  %v331_v18 = vpop.f32.mrb[3].mxu0  ;;  %v334_v20 = vmax.f32 %v326_v12, 0.0 }
  0xfa   : > { %v332_v19 = vadd.f32 %v331_v18, %v273_v14  ;;  %v335_v22 = vmax.f32 %v328_v15, 0.0 }
  0xfb   : > { %v336_v21 = vmax.f32 %v330_v17, 0.0 }
  0xfc   : > { %v337_v23 = vmax.f32 %v332_v19, 0.0 }
  0xfd   : > { %v339_v24 = vpack.c.bf16 %v336_v21, %v334_v20 }
  0xfe   : > { %v340_v25 = vpack.c.bf16 %v337_v23, %v335_v22 }
 0x100   : > { %351 = vmatprep.subr.bf16.mxu1 %v340_v25 }
 0x101   : > { %352 = vmatpush1.bf16.msra.mxu1 %v339_v24 }
 0x104   : > { %503 = vmatmul.mubr.msk.bf16.vlgmr.msra.gmra.mrb[0].mxu1 %vm347_vm2, %v338_v26 }
 0x1d7   : > { %v385_v28 = vpop.f32.mrb[0].mxu1 }
 0x1d8   : > { %v386_v29 = vadd.f32 %v385_v28, %v345_v27  ;;  %v387_v30 = vpop.f32.mrb[1].mxu1 }
 0x1d9   : > { %v388_v31 = vadd.f32 %v387_v30, %v345_v27  ;;  %v389_v32 = vpop.f32.mrb[2].mxu1 }
 0x1da   : > { %v392_v33 = vadd.f32 %v386_v29, %v255_v3  ;;  %v390_v34 = vpop.f32.mrb[3].mxu1 }
 0x1db   : > { %v393_v35 = vadd.f32 %v388_v31, %v257_v4 }
 0x1dd   : > { %v396_v36 = vcombine.low %v392_v33, %v393_v35 }
 0x1df   : > { %398 = vst [vmem:[%s242_s10] sm:$0xff] %v396_v36 }
 0x1e0   : > { %584 = shalt.err (!%p581_p5)
}
 0x1e1   : > { %s585_s25 = scalar_lea.hbm %s763_s14, 128  ;;  %s589_s7 = scalar_lea.hbm %s815_s5, 256 }
 0x1e2   : > { %p586_p6 = scmp.ne.s32.totalorder %s763_s14, %s585_s25  ;;  %p590_p10 = scmp.lt.u32.totalorder %s763_s14, %s815_s5 }
 0x1e3   : > { %p591_p11 = scmp.lt.u32.totalorder %s589_s7, %s585_s25  ;;  %p593_p13 = scmp.lt.u32.totalorder %s585_s25, %s763_s14 }
 0x1e4   : > { %p587_p7 = pnand %p586_p6, %p723_p4 }
 0x1e5   : > { %p592_p12 = por %p591_p11, %p590_p10 }
 0x1e6   : > { %p588_p9 = pneg %p587_p7 }
 0x1e7   : > { %p594_p0 = por %p593_p13, %p592_p12 }
 0x1e9   : > { %p595_p1 = pnand %p594_p0, %p588_p9 }
 0x1eb   : > { %598 = shalt.err (!%p595_p1)
}
 0x1ec   : > { %511 = dma.vmem_to_hbm [thread:$0]  (%p723_p4), %s765_s11, 128, %s763_s14, %s400_s15  }
 0x1ed PF: > { %p517_p2 = scmp.ge.s32.totalorder %s649_s23, 2  ;;  %s428_s10 = sand.u32 1, %s629_s18  }
 0x1ee   : > { %s429_s12 = scalar_lea.sflag [#allocation3], %s428_s10 }
 0x1ef   : > { %p514_p3 = pnand %p517_p2, %p730_p8 }
 0x1f1   : > { %624 = dma.done.wait (!%p514_p3), %s429_s12, 128  }
 0x1f2   : > { %626 = vsyncadd (!%p514_p3), %s429_s12, 4294967168  ;;  %s18_s23 = sadd.s32 1, %s649_s23   ;;  %s818_s18 = smov %s633_s19 }
 0x1f3   : > { %p15_p5 = scmp.ge.s32.totalorder %s18_s23, 4   ;;  %s819_s19 = smov %s637_s20 }
 0x1f4   : > { %s820_s20 = smov %s736_s6  ;;  %s821_s21 = smov %s645_s22 }
 0x1f5   : > { %s822_s22 = smov %s824_s26  ;;  %17 = sbr.rel (!%p15_p5) target bundleno = 4 (0x4), region = 75 }
 0x1fc   :  { %434 = vsyncpa [#allocation3], 1 }
 0x1fd   :  { %436 = vsyncpa [#allocation3 + $0x1], 1 }

</bundles_post_ra>
